<compile_context>
chip_gen: v6e
topology: v6e:2x2x1
jax: 0.10.0
libtpu: 0.0.40
codegen_flags: <defaults>
</compile_context>

<pallas_src>
import jax
import jax.numpy as jnp
from jax.experimental import pallas as pl
from jax.experimental.pallas import tpu as pltpu


# --------------------------------------------------------------------------- #
# Helpers
# --------------------------------------------------------------------------- #
def _cdiv(a, b):
    return -(-a // b)


def _round_up(a, b):
    return _cdiv(a, b) * b


def _pick_vmem_limit():
    """Per-generation scoped-VMEM limit: ~3/4 of physical, capped at 96 MiB.

    v7x (64 MiB physical)  -> 48 MiB (leaves headroom for compiler scratch)
    v5e/v6e (128 MiB)      -> 96 MiB (lifts the 16/32 MiB default scoped limit)
    """
    cap = None
    try:
        info = pltpu.get_tpu_info()
        cap = getattr(info, "vmem_capacity_bytes", None)
    except Exception:
        cap = None
    if not cap:
        cap = 64 * 1024 * 1024  # conservative default: v7x per-core VMEM
    return int(min(96 * 1024 * 1024, (int(cap) * 3) // 4))


def _choose_batch_block(B, bytes_per_batch, block_target):
    """Pick batches-per-step: as big as the VMEM budget allows, >=2 steps when
    B >= 2 (so a v7x megacore can shard the parallel axis), and prefer an even
    step count."""
    bb = max(1, min(B, block_target // max(bytes_per_batch, 1)))
    if B >= 2:
        bb = min(bb, _cdiv(B, 2))            # at least 2 grid steps
    n = _cdiv(B, bb)
    if n > 1 and n % 2 == 1:                 # prefer even step count (2 TCs on v7x)
        bb_even = _cdiv(B, n + 1)
        if bb_even >= 1 and _cdiv(B, bb_even) % 2 == 0:
            bb = bb_even
            n = _cdiv(B, bb)
    return bb, n


# --------------------------------------------------------------------------- #
# Fused single-pass kernel (main path: one batch block fits in VMEM)
# --------------------------------------------------------------------------- #
def _make_fused_kernel(hw, cr, use_vpu):
    """ChannelGate kernel specialized on static parameters.

    If use_vpu: the first Linear's weights arrive transposed, shape (Cr, C),
    so every intermediate keeps C on the lane axis.  Otherwise weights arrive
    as (C, Cr) and the MLP runs on the MXU via jnp.dot.
    """
    inv_hw = 1.0 / float(hw)

    def kernel(x_ref, w1_ref, b1_ref, w2_ref, b2_ref, o_ref):
        x = x_ref[...]                                    # (bb, C, HW)
        xf = x.astype(jnp.float32)
        bb = x.shape[0]

        # Global average / max pooling over the spatial (lane) axis.
        avg = jnp.sum(xf, axis=2) * inv_hw                # (bb, C)
        mx = jnp.max(xf, axis=2)                          # (bb, C)

        # Shared 2-layer MLP on both pooled vectors in one pass.
        p = jnp.concatenate([avg, mx], axis=0)            # (2*bb, C)
        w1 = w1_ref[...].astype(jnp.float32)
        b1 = b1_ref[...].astype(jnp.float32)               # (1, Cr)
        w2 = w2_ref[...].astype(jnp.float32)               # (Cr, C)
        b2 = b2_ref[...].astype(jnp.float32)               # (1, C)

        if use_vpu:
            # Tiny hidden dim: loop over the Cr hidden units, keeping C on the
            # lane axis throughout (no 3-D intermediates, no MXU tile waste).
            att2 = b2                                      # (1, C) -> broadcasts
            for j in range(cr):
                hj = jnp.sum(p * w1[j:j + 1, :], axis=1, keepdims=True) \
                    + b1[:, j:j + 1]                       # (2*bb, 1)
                hj = jnp.maximum(hj, 0.0)
                att2 = att2 + hj * w2[j:j + 1, :]          # (2*bb, C)
        else:
            h = jnp.dot(p, w1, preferred_element_type=jnp.float32) + b1
            h = jnp.maximum(h, 0.0)
            att2 = jnp.dot(h, w2, preferred_element_type=jnp.float32) + b2

        att = att2[:bb] + att2[bb:]                        # avg path + max path
        scale = jax.nn.sigmoid(att)                        # (bb, C), f32

        # Bandwidth-bound part: broadcast-multiply and store.
        o_ref[...] = (xf * scale[:, :, None]).astype(o_ref.dtype)

    return kernel


# --------------------------------------------------------------------------- #
# Spatially-tiled fallback (one batch's C*HW block does not fit in VMEM)
# --------------------------------------------------------------------------- #
def _make_pool_kernel(ts, hw):
    inv_hw = 1.0 / float(hw)

    def kernel(x_ref, o_ref, sum_sc, max_sc):
        s = pl.program_id(1)

        @pl.when(s == 0)
        def _():
            sum_sc[...] = jnp.zeros_like(sum_sc)
            max_sc[...] = jnp.full_like(max_sc, -jnp.inf)

        x = x_ref[...].astype(jnp.float32)                 # (1, C, ts)
        # Only the tail spatial tile has invalid lanes; the mask is cheap
        # relative to the (rare) extra HBM pass this fallback already implies.
        lane = jax.lax.broadcasted_iota(jnp.int32, x.shape, 2) + s * ts
        valid = lane < hw
        sum_sc[...] = sum_sc[...] + jnp.sum(jnp.where(valid, x, 0.0), axis=2)
        max_sc[...] = jnp.maximum(
            max_sc[...], jnp.max(jnp.where(valid, x, -jnp.inf), axis=2))

        @pl.when(s == pl.num_programs(1) - 1)
        def _():
            o_ref[...] = jnp.stack([sum_sc[...] * inv_hw, max_sc[...]], axis=1)

    return kernel


def _apply_kernel(x_ref, s_ref, o_ref):
    o_ref[...] = (x_ref[...].astype(jnp.float32) * s_ref[...]).astype(o_ref.dtype)


def _channel_gate_tiled(x_flat, w1, b1, w2, b2, *, vmem_limit, block_target,
                        spatial_tile=None):
    """Two-pass path for very large C*HW (e.g. the v7x 64 MiB VMEM cliff):
    pass 1 accumulates pooled stats over spatial tiles, pass 2 applies the gate.
    """
    B, C, HW = x_flat.shape
    itemsize = x_flat.dtype.itemsize
    c_pad = _round_up(C, 8)

    if spatial_tile is None:
        ts = max(128, (block_target // (c_pad * itemsize)) // 128 * 128)
    else:
        ts = spatial_tile
    ts = min(ts, _round_up(HW, 128))
    ns = _cdiv(HW, ts)

    pooled = pl.pallas_call(
        _make_pool_kernel(ts, HW),
        out_shape=jax.ShapeDtypeStruct((B, 2, C), jnp.float32),
        grid_spec=pltpu.PrefetchScalarGridSpec(
            num_scalar_prefetch=0,
            grid=(B, ns),
            in_specs=[pl.BlockSpec((1, C, ts), lambda i, s: (i, 0, s))],
            out_specs=pl.BlockSpec((1, 2, C), lambda i, s: (i, 0, 0)),
            scratch_shapes=[pltpu.VMEM((1, C), jnp.float32),
                            pltpu.VMEM((1, C), jnp.float32)],
        ),
        compiler_params=pltpu.CompilerParams(
            dimension_semantics=("parallel", "arbitrary"),
            vmem_limit_bytes=vmem_limit,
        ),
        cost_estimate=pl.CostEstimate(flops=2 * B * C * HW, transcendentals=0,
                                      bytes_accessed=B * C * HW * itemsize),
    )(x_flat)

    avg = pooled[:, 0, :]
    mx = pooled[:, 1, :]

    # The (B, C) MLP + sigmoid is microscopic; let XLA run it between the two
    # bandwidth-bound Pallas passes.
    def mlp(v):
        h = jnp.maximum(v @ w1 + b1, 0.0)
        return h @ w2 + b2

    scale = jax.nn.sigmoid(mlp(avg) + mlp(mx)).astype(jnp.float32)[:, :, None]

    out_flat = pl.pallas_call(
        _apply_kernel,
        out_shape=jax.ShapeDtypeStruct((B, C, HW), x_flat.dtype),
        grid_spec=pltpu.PrefetchScalarGridSpec(
            num_scalar_prefetch=0,
            grid=(B, ns),
            in_specs=[pl.BlockSpec((1, C, ts), lambda i, s: (i, 0, s)),
                      pl.BlockSpec((1, C, 1), lambda i, s: (i, 0, 0))],
            out_specs=pl.BlockSpec((1, C, ts), lambda i, s: (i, 0, s)),
        ),
        compiler_params=pltpu.CompilerParams(
            dimension_semantics=("parallel", "arbitrary"),
            vmem_limit_bytes=vmem_limit,
        ),
        cost_estimate=pl.CostEstimate(flops=B * C * HW, transcendentals=0,
                                      bytes_accessed=2 * B * C * HW * itemsize),
    )(x_flat, scale)
    return out_flat


# --------------------------------------------------------------------------- #
# Public wrapper
# --------------------------------------------------------------------------- #
def channel_gate(x, w1, b1, w2, b2, *, donate_x=False, force_fallback=False,
                 spatial_tile=None):
    """ChannelGate forward.

    x: (B, C, H, W).  w1: (C, Cr), b1: (Cr,), w2: (Cr, C), b2: (C,).
    Linear weights are stored (in, out) — transposed vs. PyTorch nn.Linear —
    so the math is v @ w + b.  Set donate_x=True to alias the output into x's
    buffer when x is dead after this call.
    """
    B, C, H, W = x.shape
    HW = H * W
    Cr = w1.shape[1]
    itemsize = x.dtype.itemsize

    x_flat = x.reshape(B, C, HW)

    vmem_limit = _pick_vmem_limit()
    # Double-buffered input + output blocks dominate VMEM: block ~ limit / 4.
    block_target = (vmem_limit - 4 * 1024 * 1024) // 4

    # Conservative per-batch VMEM footprint estimate (8x128 tile rounding).
    bytes_per_batch = _round_up(C, 8) * _round_up(HW, 128) * itemsize

    if force_fallback or bytes_per_batch > block_target:
        out_flat = _channel_gate_tiled(x_flat, w1, b1, w2, b2,
                                       vmem_limit=vmem_limit,
                                       block_target=block_target,
                                       spatial_tile=spatial_tile)
        return out_flat.reshape(B, C, H, W)

    bb, n_steps = _choose_batch_block(B, bytes_per_batch, block_target)

    use_vpu = Cr <= 8
    kernel = _make_fused_kernel(HW, Cr, use_vpu)

    # VPU path wants W1 transposed (Cr, C) so every intermediate is lane-dense.
    w1_in = w1.T if use_vpu else w1
    b1_2d = b1.reshape(1, Cr)
    b2_2d = b2.reshape(1, C)
    w1_block = tuple(w1_in.shape)

    flops = 3 * B * C * HW + 8 * B * C * Cr
    bytes_accessed = 2 * B * C * HW * itemsize + (2 * C * Cr + Cr + C) * 4

    out_flat = pl.pallas_call(
        kernel,
        out_shape=jax.ShapeDtypeStruct((B, C, HW), x.dtype),
        grid_spec=pltpu.PrefetchScalarGridSpec(
            num_scalar_prefetch=0,
            grid=(n_steps,),  # cdiv grid: tail block rows beyond B are dropped
            in_specs=[
                pl.BlockSpec((bb, C, HW), lambda i: (i, 0, 0)),
                pl.BlockSpec(w1_block, lambda i: (0, 0)),
                pl.BlockSpec((1, Cr), lambda i: (0, 0)),
                pl.BlockSpec((Cr, C), lambda i: (0, 0)),
                pl.BlockSpec((1, C), lambda i: (0, 0)),
            ],
            out_specs=pl.BlockSpec((bb, C, HW), lambda i: (i, 0, 0)),
        ),
        compiler_params=pltpu.CompilerParams(
            dimension_semantics=("parallel",),
            vmem_limit_bytes=vmem_limit,
        ),
        cost_estimate=pl.CostEstimate(flops=flops,
                                      transcendentals=2 * B * C,
                                      bytes_accessed=bytes_accessed),
        input_output_aliases=({0: 0} if donate_x else {}),
    )(x_flat, w1_in, b1_2d, w2, b2_2d)

    return out_flat.reshape(B, C, H, W)


def channel_gate_ref(x, w1, b1, w2, b2):
    """Pure-JAX reference matching the PyTorch forward pass."""
    avg = jnp.mean(x, axis=(2, 3))     # (B, C)
    mx = jnp.max(x, axis=(2, 3))       # (B, C)

    def mlp(v):
        h = jnp.maximum(v @ w1 + b1, 0.0)
        return h @ w2 + b2

    att = mlp(avg) + mlp(mx)
    scale = jax.nn.sigmoid(att)[:, :, None, None]
    return x * scale


if __name__ == "__main__":
    # gate_channels=32, reduction_ratio=16 -> hidden=2
    B, C, H, W = 2, 32, 16, 16
    reduction_ratio = 16
    Cr = C // reduction_ratio

    key = jax.random.PRNGKey(0)
    kx, k1, k2, k3, k4 = jax.random.split(key, 5)

    x = jax.random.normal(kx, (B, C, H, W), dtype=jnp.float32)

    # Deterministic parameter init (weights stored as (in, out)).
    w1 = jax.random.normal(k1, (C, Cr), dtype=jnp.float32) * (1.0 / jnp.sqrt(C))
    b1 = jax.random.normal(k2, (Cr,), dtype=jnp.float32) * 0.01
    w2 = jax.random.normal(k3, (Cr, C), dtype=jnp.float32) * (1.0 / jnp.sqrt(Cr))
    b2 = jax.random.normal(k4, (C,), dtype=jnp.float32) * 0.01

    out = jax.block_until_ready(channel_gate(x, w1, b1, w2, b2))
    ref = channel_gate_ref(x, w1, b1, w2, b2)
    assert out.shape == (B, C, H, W)
    assert jnp.allclose(out, ref, atol=1e-5, rtol=1e-5), "fused path mismatch"

    # Non-multiple-of-128 spatial extent + non-dividing batch on the fused path
    # (masked tail stores, no host-side pad/slice, cdiv batch grid).
    x2 = jax.random.normal(kx, (3, C, 13, 11), dtype=jnp.float32)
    out2 = jax.block_until_ready(channel_gate(x2, w1, b1, w2, b2))
    ref2 = channel_gate_ref(x2, w1, b1, w2, b2)
    assert jnp.allclose(out2, ref2, atol=1e-5, rtol=1e-5), "tail-store mismatch"

    # Spatially-tiled fallback path (the large-C*HW / v7x VMEM-cliff route).
    out3 = jax.block_until_ready(
        channel_gate(x2, w1, b1, w2, b2, force_fallback=True, spatial_tile=128))
    assert jnp.allclose(out3, ref2, atol=1e-5, rtol=1e-5), "fallback mismatch"

    print("KERNEL_OK")
</pallas_src>

<mosaic_0001>
module attributes {stable_mosaic.version = 11 : i64} {
  func.func @kernel(%arg0: i32, %arg1: memref<1x32x256xf32, #tpu.memory_space<vmem>>, %arg2: memref<2x32xf32, #tpu.memory_space<vmem>>, %arg3: memref<1x2xf32, #tpu.memory_space<vmem>>, %arg4: memref<2x32xf32, #tpu.memory_space<vmem>>, %arg5: memref<1x32xf32, #tpu.memory_space<vmem>>, %arg6: memref<1x32x256xf32, #tpu.memory_space<vmem>>) attributes {dimension_semantics = [#tpu.dimension_semantics<parallel>], iteration_bounds = array<i64: 2>, scalar_prefetch = 0 : i64, scratch_operands = 0 : i64, tpu.core_type = #tpu.core_type<tc>, window_params = [{transform_indices = @transform_0, window_bounds = array<i64: 1, 32, 256>}, {pipeline_mode = #tpu.pipeline_mode<synchronous>, transform_indices = @transform_1, window_bounds = array<i64: 2, 32>}, {pipeline_mode = #tpu.pipeline_mode<synchronous>, transform_indices = @transform_2, window_bounds = array<i64: 1, 2>}, {pipeline_mode = #tpu.pipeline_mode<synchronous>, transform_indices = @transform_3, window_bounds = array<i64: 2, 32>}, {pipeline_mode = #tpu.pipeline_mode<synchronous>, transform_indices = @transform_4, window_bounds = array<i64: 1, 32>}, {transform_indices = @transform_5, window_bounds = array<i64: 1, 32, 256>}]} {
    %c0 = arith.constant 0 : index
    %c0_0 = arith.constant 0 : index
    %c0_1 = arith.constant 0 : index
    %0 = vector.load %arg1[%c0, %c0_0, %c0_1] : memref<1x32x256xf32, #tpu.memory_space<vmem>>, vector<1x32x256xf32>
    %cst = arith.constant dense<0.000000e+00> : vector<1x32xf32>
    %1 = vector.multi_reduction <add>, %0, %cst [2] : vector<1x32x256xf32> to vector<1x32xf32>
    %cst_2 = arith.constant 3.906250e-03 : f32
    %2 = vector.broadcast %cst_2 : f32 to vector<1x32xf32>
    %3 = arith.mulf %1, %2 : vector<1x32xf32>
    %cst_3 = arith.constant dense<0xFF800000> : vector<1x32xf32>
    %4 = vector.multi_reduction <maximumf>, %0, %cst_3 [2] : vector<1x32x256xf32> to vector<1x32xf32>
    %5 = tpu.concatenate %3, %4 in 0 : vector<1x32xf32>, vector<1x32xf32> -> vector<2x32xf32>
    %c0_4 = arith.constant 0 : index
    %c0_5 = arith.constant 0 : index
    %6 = vector.load %arg2[%c0_4, %c0_5] : memref<2x32xf32, #tpu.memory_space<vmem>>, vector<2x32xf32>
    %c0_6 = arith.constant 0 : index
    %c0_7 = arith.constant 0 : index
    %7 = vector.load %arg3[%c0_6, %c0_7] : memref<1x2xf32, #tpu.memory_space<vmem>>, vector<1x2xf32>
    %c0_8 = arith.constant 0 : index
    %c0_9 = arith.constant 0 : index
    %8 = vector.load %arg4[%c0_8, %c0_9] : memref<2x32xf32, #tpu.memory_space<vmem>>, vector<2x32xf32>
    %c0_10 = arith.constant 0 : index
    %c0_11 = arith.constant 0 : index
    %9 = vector.load %arg5[%c0_10, %c0_11] : memref<1x32xf32, #tpu.memory_space<vmem>>, vector<1x32xf32>
    %10 = vector.extract_strided_slice %6 {offsets = [0, 0], sizes = [1, 32], strides = [1, 1]} : vector<2x32xf32> to vector<1x32xf32>
    %11 = vector.broadcast %10 : vector<1x32xf32> to vector<2x32xf32>
    %12 = arith.mulf %5, %11 : vector<2x32xf32>
    %cst_12 = arith.constant dense<0.000000e+00> : vector<2xf32>
    %13 = vector.multi_reduction <add>, %12, %cst_12 [1] : vector<2x32xf32> to vector<2xf32>
    %14 = vector.shape_cast %13 : vector<2xf32> to vector<2x1xf32>
    %15 = vector.extract_strided_slice %7 {offsets = [0, 0], sizes = [1, 1], strides = [1, 1]} : vector<1x2xf32> to vector<1x1xf32>
    %16 = vector.broadcast %15 : vector<1x1xf32> to vector<2x1xf32>
    %17 = arith.addf %14, %16 : vector<2x1xf32>
    %cst_13 = arith.constant 0.000000e+00 : f32
    %18 = vector.broadcast %cst_13 : f32 to vector<2x1xf32>
    %19 = arith.maximumf %17, %18 : vector<2x1xf32>
    %20 = vector.extract_strided_slice %8 {offsets = [0, 0], sizes = [1, 32], strides = [1, 1]} : vector<2x32xf32> to vector<1x32xf32>
    %21 = vector.broadcast %19 : vector<2x1xf32> to vector<2x32xf32>
    %22 = vector.broadcast %20 : vector<1x32xf32> to vector<2x32xf32>
    %23 = arith.mulf %21, %22 : vector<2x32xf32>
    %24 = vector.broadcast %9 : vector<1x32xf32> to vector<2x32xf32>
    %25 = arith.addf %24, %23 : vector<2x32xf32>
    %26 = vector.extract_strided_slice %6 {offsets = [1, 0], sizes = [1, 32], strides = [1, 1]} : vector<2x32xf32> to vector<1x32xf32>
    %27 = vector.broadcast %26 : vector<1x32xf32> to vector<2x32xf32>
    %28 = arith.mulf %5, %27 : vector<2x32xf32>
    %cst_14 = arith.constant dense<0.000000e+00> : vector<2xf32>
    %29 = vector.multi_reduction <add>, %28, %cst_14 [1] : vector<2x32xf32> to vector<2xf32>
    %30 = vector.shape_cast %29 : vector<2xf32> to vector<2x1xf32>
    %31 = vector.extract_strided_slice %7 {offsets = [0, 1], sizes = [1, 1], strides = [1, 1]} : vector<1x2xf32> to vector<1x1xf32>
    %32 = vector.broadcast %31 : vector<1x1xf32> to vector<2x1xf32>
    %33 = arith.addf %30, %32 : vector<2x1xf32>
    %cst_15 = arith.constant 0.000000e+00 : f32
    %34 = vector.broadcast %cst_15 : f32 to vector<2x1xf32>
    %35 = arith.maximumf %33, %34 : vector<2x1xf32>
    %36 = vector.extract_strided_slice %8 {offsets = [1, 0], sizes = [1, 32], strides = [1, 1]} : vector<2x32xf32> to vector<1x32xf32>
    %37 = vector.broadcast %35 : vector<2x1xf32> to vector<2x32xf32>
    %38 = vector.broadcast %36 : vector<1x32xf32> to vector<2x32xf32>
    %39 = arith.mulf %37, %38 : vector<2x32xf32>
    %40 = arith.addf %25, %39 : vector<2x32xf32>
    %41 = vector.extract_strided_slice %40 {offsets = [0, 0], sizes = [1, 32], strides = [1, 1]} : vector<2x32xf32> to vector<1x32xf32>
    %42 = vector.extract_strided_slice %40 {offsets = [1, 0], sizes = [1, 32], strides = [1, 1]} : vector<2x32xf32> to vector<1x32xf32>
    %43 = arith.addf %41, %42 : vector<1x32xf32>
    %44 = arith.negf %43 : vector<1x32xf32>
    %45 = math.exp %44 : vector<1x32xf32>
    %cst_16 = arith.constant 1.000000e+00 : f32
    %46 = vector.broadcast %cst_16 : f32 to vector<1x32xf32>
    %47 = arith.addf %46, %45 : vector<1x32xf32>
    %48 = arith.divf %46, %47 : vector<1x32xf32>
    %49 = vector.shape_cast %48 : vector<1x32xf32> to vector<1x32x1xf32>
    %50 = vector.broadcast %49 : vector<1x32x1xf32> to vector<1x32x256xf32>
    %51 = arith.mulf %0, %50 : vector<1x32x256xf32>
    %c0_17 = arith.constant 0 : index
    %c0_18 = arith.constant 0 : index
    %c0_19 = arith.constant 0 : index
    %52 = vector.load %arg6[%c0_17, %c0_18, %c0_19] : memref<1x32x256xf32, #tpu.memory_space<vmem>>, vector<1x32x256xf32>
    tpu.vector_store %arg6[%c0_17, %c0_18, %c0_19], %51 {strides = array<i32>} : memref<1x32x256xf32, #tpu.memory_space<vmem>>, vector<1x32x256xf32>,
    return
  }
  func.func @transform_0(%arg0: i32) -> (i32, i32, i32) {
    %c0_i32 = arith.constant 0 : i32
    %c0_i32_0 = arith.constant 0 : i32
    %c0_i32_1 = arith.constant 0 : i32
    return %arg0, %c0_i32, %c0_i32_0 : i32, i32, i32
  }
  func.func @transform_1(%arg0: i32) -> (i32, i32) {
    %c0_i32 = arith.constant 0 : i32
    %c0_i32_0 = arith.constant 0 : i32
    %c0_i32_1 = arith.constant 0 : i32
    return %c0_i32, %c0_i32_0 : i32, i32
  }
  func.func @transform_2(%arg0: i32) -> (i32, i32) {
    %c0_i32 = arith.constant 0 : i32
    %c0_i32_0 = arith.constant 0 : i32
    %c0_i32_1 = arith.constant 0 : i32
    return %c0_i32, %c0_i32_0 : i32, i32
  }
  func.func @transform_3(%arg0: i32) -> (i32, i32) {
    %c0_i32 = arith.constant 0 : i32
    %c0_i32_0 = arith.constant 0 : i32
    %c0_i32_1 = arith.constant 0 : i32
    return %c0_i32, %c0_i32_0 : i32, i32
  }
  func.func @transform_4(%arg0: i32) -> (i32, i32) {
    %c0_i32 = arith.constant 0 : i32
    %c0_i32_0 = arith.constant 0 : i32
    %c0_i32_1 = arith.constant 0 : i32
    return %c0_i32, %c0_i32_0 : i32, i32
  }
  func.func @transform_5(%arg0: i32) -> (i32, i32, i32) {
    %c0_i32 = arith.constant 0 : i32
    %c0_i32_0 = arith.constant 0 : i32
    %c0_i32_1 = arith.constant 0 : i32
    return %arg0, %c0_i32, %c0_i32_0 : i32, i32, i32
  }
}

</mosaic_0001>

<bundles_post_ra>
// kernel: tpu_custom_call.1
= control target key start
LH: loop header
LB: loop body
LE: loop exit
PB: predicated region body
PF: predicated region fallthrough
CT: control target
= control target key end

     0   :  { %10 = vsyncpa [#allocation3], 0  ;;  %s1051_s0 = inlined_call_operand.hbm [shape: f32[2,32,256], index: 0, kind: input, shape index: {}]   ;;  %s1052_s1 = inlined_call_operand.hbm [shape: f32[2,32], index: 1, kind: input, shape index: {}]   ;;  %s1053_s2 = inlined_call_operand.vmem [shape: f32[1,2], index: 2, kind: input, shape index: {}]   ;;  %s1054_s3 = inlined_call_operand.vmem [shape: f32[2,32], index: 3, kind: input, shape index: {}]   ;;  %s1055_s4 = inlined_call_operand.vmem [shape: f32[1,32], index: 4, kind: input, shape index: {}]   ;;  %s1056_s5 = inlined_call_operand.hbm [shape: f32[2,32,256], index: 5, kind: output, shape index: {}]  }
   0x1   :  { %12 = vsyncpa [#allocation3 + $0x1], 0 }
   0x2   :  { %13 = vsyncpa [#allocation6], 0 }
   0x3   :  { %14 = vsyncpa [#allocation4], 0 }
   0x4   :  { %16 = vsyncpa [#allocation4 + $0x1], 0  ;;  %s805_s18 = smov 0   ;;  %s807_s19 = smov 0  }
   0x5   :  { %s809_s20 = smov 0   ;;  %s811_s21 = smov 0  }
   0x6 LB: > { %s826_s22 = sadd.s32 4294967295, %s764_s21   ;;  %s551_s23 = sadd.s32 4294967294, %s764_s21   ;;  %s764_s21 = sphi %s811_s21, %s1079_s21   ;;  %s760_s20 = sphi %s809_s20, %s1078_s20   ;;  %s756_s19 = sphi %s807_s19, %s1077_s19   ;;  %s752_s18 = sphi %s805_s18, %s1076_s18  }
   0x7   : > { %s830_s24 = sadd.s32 1, %s764_s21   ;;  %s29_s25 = sadd.s32 1, %s760_s20 }
   0x8   : > { %s26_s26 = ssub.s32 %s764_s21, %s830_s24  ;;  %p36_p0 = scmp.ne.s32.totalorder %s760_s20, %s756_s19 }
   0x9   : > { %p27_p1 = scmp.eq.s32.totalorder %s26_s26, 0  ;;  %p37_p2 = scmp.eq.s32.totalorder %s764_s21, 0 }
   0xa   : > { %p42_p3 = scmp.ne.s32.totalorder %s756_s19, %s752_s18  ;;  %p1057_p4 = scmp.eq.s32.totalorder %s826_s22, 0 }
   0xb   : > { %s842_s27 = scalar_select %p27_p1, %s760_s20, %s29_s25  }
   0xc   : > { %p844_p5 = por %p37_p2, %p36_p0  ;;  %p850_p6 = por %p1057_p4, %p42_p3 }
   0xd   : > { %p150_p7 = scmp.eq.s32.totalorder %s826_s22, 1  ;;  %p156_p8 = scmp.eq.s32.totalorder %s551_s23, 1 }
   0xe   : > { %s1062_s29 = scalar_select %p850_p6, 1, 0 }
   0xf   : > { %p552_p9 = scmp.ge.s32.totalorder %s764_s21, 1  ;;  %p163_p10 = scmp.lt.s32.totalorder %s764_s21, 3 }
  0x10   : > { %p857_p11 = por %p150_p7, %p36_p0  ;;  %p861_p12 = por %p156_p8, %p42_p3 }
  0x11   : > { %p865_p13 = pnand %p552_p9, %p163_p10  ;;  %s766_s8 = smov [#allocation5]  }
  0x12   : > { %s1063_s30 = scalar_select %p857_p11, 1, 0 }
  0x13   : > { %s1064_s6 = scalar_select %p861_p12, 1, 0 }
  0x14   : > { %s1065_s7 = scalar_select %p865_p13, 1, 0 }
  0x15   : > { %p580_p2 = pneg %p865_p13  ;;  %s176_s9 = sshll.u32 %s766_s8, 4  ;;  %s177_s9 = int_to_ptr.vmem [resolvable:$true] %s176_s9 }
  0x16   : > { %p593_p4 = scmp.lt.s32.totalorder %s764_s21, 2  ;;  %p1066_p0 = scmp.eq.s32.totalorder %s826_s22, 0 }
  0x17   : > { %s196_s11 = sand.u32 1, %s760_s20   ;;  %s653_s14 = scalar_lea.vmem %s177_s9, 32 }
  0x18   : > { %p875_p7 = pnand %p580_p2, %p1066_p0  ;;  %p882_p3 = pnand %p593_p4, %p844_p5 }
  0x19   : > { %s555_s13 = sshll.u32 %s196_s11, 6  ;;  %p654_p9 = scmp.ne.s32.totalorder %s177_s9, %s653_s14 }
  0x1a   : > { %p644_p8 = pneg %p875_p7  ;;  %p661_p12 = scmp.lt.s32.totalorder %s177_s9, %s177_s9 }
  0x1b   : > { %p662_p11 = scmp.lt.s32.totalorder %s653_s14, %s653_s14 }
  0x1c   : > { %p656_p10 = pnand %p654_p9, %p644_p8 }
  0x1d   : > { %p663_p2 = por %p662_p11, %p661_p12 }
  0x1e   : > { %p657_p1 = pneg %p656_p10 }
  0x20   : > { %p664_p0 = pnand %p663_p2, %p657_p1 }
  0x22   : > { %667 = shalt.err (!%p664_p0)
}
  0x23   : > { %583 = dma.hbm_to_vmem [thread:$0]  (!%p875_p7), %s1052_s1, 32, %s177_s9, [#allocation6]  }
  0x24   : > { %s570_s17 = sshll.u32 %s764_s21, 10  ;;  %s200_s23 = scalar_lea.vmem [#allocation2], %s555_s13 }
  0x25   : > { %s207_s25 = sshll.u32 %s200_s23, 4  ;;  %s897_s8 = scalar_lea.hbm %s1051_s0, %s570_s17  ;;  %s899_s25 = int_to_ptr.vmem [resolvable:$true] %s207_s25 }
  0x26   : > { %s901_s10 = scalar_lea.sflag [#allocation3], %s196_s11  ;;  %s668_s14 = scalar_lea.hbm %s897_s8, 1024 }
  0x27   : > { %p669_p4 = scmp.ne.s32.totalorder %s897_s8, %s668_s14  ;;  %p670_p5 = pneg %p882_p3 }
  0x28   : > { %s673_s15 = scalar_lea.hbm %s1051_s0, 2048  ;;  %p674_p1 = scmp.lt.s32.totalorder %s897_s8, %s1051_s0 }
  0x29   : > { %p671_p11 = pnand %p670_p5, %p669_p4  ;;  %p675_p7 = scmp.lt.s32.totalorder %s673_s15, %s668_s14 }
  0x2b   : > { %p672_p12 = pneg %p671_p11  ;;  %p676_p8 = por %p675_p7, %p674_p1 }
  0x2d   : > { %p677_p9 = pnand %p676_p8, %p672_p12 }
  0x2f   : > { %680 = shalt.err (!%p677_p9)
}
  0x30   : > { %s681_s11 = scalar_lea.vmem %s899_s25, 1024  ;;  %s767_s23 = smov [#allocation2]  }
  0x31   : > { %p682_p10 = scmp.ne.s32.totalorder %s899_s25, %s681_s11  ;;  %s686_s26 = sshll.u32 %s767_s23, 4  ;;  %s687_s26 = int_to_ptr.vmem [resolvable:$false] %s686_s26 }
  0x32   : > { %s688_s28 = scalar_lea.vmem %s687_s26, 2048  ;;  %p689_p4 = scmp.lt.s32.totalorder %s899_s25, %s687_s26 }
  0x33   : > { %p684_p2 = pnand %p682_p10, %p670_p5  ;;  %p690_p11 = scmp.lt.s32.totalorder %s688_s28, %s681_s11 }
  0x35   : > { %p685_p0 = pneg %p684_p2  ;;  %p691_p6 = por %p690_p11, %p689_p4 }
  0x37   : > { %p692_p13 = pnand %p691_p6, %p685_p0 }
  0x39   : > { %695 = shalt.err (!%p692_p13)
}
  0x3a   : > { %s768_s14 = smov 256   ;;  %s769_s9 = smov 16  }
  0x3b   : > { %587 = dma.hbm_to_vmem [thread:$0]  (!%p882_p3), %s897_s8, 1024, %s899_s25, %s901_s10, %s768_s14, %s768_s14, %s769_s9  }
  0x3c   : > { %p1069_p5 = scmp.ne.s32.totalorder %s1065_s7, 0 }
  0x3d   : > { %s925_s13 = sand.u32 (!%p1069_p5), 1, %s756_s19   ;;  %p1070_p6 = scmp.ne.s32.totalorder (!%p1069_p5), %s1062_s29, 0 }
  0x3e   : > { %219 = sbr.rel (%p1069_p5) target bundleno = 686 (0x2ae), region = 40  ;;  %s559_s15 = sshll.u32 (!%p1069_p5), %s925_s13, 6 }
  0x3f   : > { %s222_s16 = scalar_lea.sflag (!%p1069_p5), [#allocation3], %s925_s13  ;;  %s225_s17 = scalar_lea.vmem (!%p1069_p5), [#allocation2], %s559_s15 }
  0x43   : > { %739 = dma.done.wait (%p1070_p6), %s222_s16, 1024  }
  0x44   : > { %741 = vsyncadd (%p1070_p6), %s222_s16, 4294966272  ;;  %p1071_p13 = scmp.eq.s32.totalorder %s826_s22, 0 }
  0x46   : > { %743 = dma.done.wait (%p1071_p13), [#allocation6], 32   ;;  %p1072_p3 = pmov %p1071_p13 }
  0x47   : > { %v939_v0 = vld [vmem:[%s225_s17 + $0x20] sm:$0xff]  ;;  %v941_v1 = vld [vmem:[%s225_s17 + $0x28] sm:$0xff]  ;;  %v949_v5 = vld [vmem:[%s225_s17 + $0x30] sm:$0xff]  ;;  %v296_v16 = vlaneseq  ;;  %vm307_vm0 = vcmask 130112   ;;  %vm314_vm1 = vcmask 195712   ;;  %vm321_vm2 = vcmask 261312  }
  0x48   : > { %745 = vsyncadd (%p1072_p3), [#allocation6], 4294967264  ;;  %v943_v2 = vld [vmem:[%s225_s17] sm:$0xff]  ;;  %v270_v3 = vadd.f32 %v941_v1, %v939_v0  ;;  %v947_v4 = vld [vmem:[%s225_s17 + $0x8] sm:$0xff]  ;;  %v286_v15 = vmax.f32 %v939_v0, %v941_v1  ;;  %vm348_vm3 = vcmask 1040384   ;;  %vm359_vm4 = vcmask 254976  }
  0x49   : > { %v951_v6 = vld [vmem:[%s225_s17 + $0x38] sm:$0xff]  ;;  %v264_v7 = vadd.f32 %v947_v4, %v943_v2  ;;  %v955_v8 = vld [vmem:[%s225_s17 + $0x10] sm:$0xff]  ;;  %v280_v13 = vmax.f32 %v943_v2, %v947_v4  ;;  %v297_v17 = vand.u32 127, %v296_v16  ;;  %v971_v20 = vshrl.u32 %v296_v16, 7  ;;  %v350_v45 = vld [vmem:[#allocation5] sm:$0x3] }
  0x4a   : > { %v957_v9 = vld [vmem:[%s225_s17 + $0x18] sm:$0xff]  ;;  %271 = vadd.xlane.f32.xlu1 %v270_v3  ;;  %v273_v10 = vadd.f32 %v951_v6, %v949_v5  ;;  %v289_v14 = vmax.f32 %v949_v5, %v951_v6  ;;  %v770_v62 = vmov 1   ;;  %v771_v63 = vmov 0   ;;  %v562_v3 = vld [vmem:[%s1053_s2] ss:$0 sm:$0xff]  ;;  %s255_s11 = scalar_lea.vmem [#allocation7], %s559_s15 }
  0x4b   : > { %265 = vadd.xlane.f32.xlu0 %v264_v7  ;;  %v267_v11 = vadd.f32 %v957_v9, %v955_v8  ;;  %v283_v12 = vmax.f32 %v955_v8, %v957_v9  ;;  %v302_v19 = vadd.s32 4294967288, %v297_v17  ;;  %v309_v22 = vadd.s32 4294967280, %v297_v17  ;;  %636 = vset.pattern.permute.xlu1 %v770_v62  ;;  %s468_s23 = sshll.u32 %s255_s11, 4  ;;  %s571_s26 = sshll.u32 %s826_s22, 10  ;;  %s1001_s23 = int_to_ptr.vmem [resolvable:$true] %s468_s23 }
  0x4c   : > { %v300_v25 = vsub.s32 %v297_v17, %v971_v20  ;;  %v316_v27 = vadd.s32 4294967272, %v297_v17  ;;  %v390_v38 = vsub.s32 1, %v971_v20  ;;  %v356_v42 = vsub.s32 0, %v971_v20  ;;  %635 = vset.pattern.permute.xlu0 %v771_v63  ;;  %s1006_s9 = scalar_lea.hbm %s1056_s5, %s571_s26  ;;  %s455_s22 = scalar_lea.sflag [#allocation4], %s925_s13 }
  0x4d   : > { %v305_v24 = vsub.s32 %v302_v19, %v971_v20  ;;  %v312_v30 = vsub.s32 %v309_v22, %v971_v20  ;;  %v563_v19 = vld [vmem:[%s1055_s4] ss:$0 sm:$0xff]  ;;  %s696_s15 = scalar_lea.vmem %s1001_s23, 1024  ;;  %p1073_p1 = scmp.ne.s32.totalorder %s1063_s30, 0 }
  0x4e   : > { %274 = vadd.xlane.f32.xlu1 %v273_v10  ;;  %v319_v35 = vsub.s32 %v316_v27, %v971_v20  ;;  %v391_v52 = vrot.slane %v350_v45, %v390_v38  ;;  %v357_v53 = vrot.slane %v350_v45, %v356_v42  ;;  %p697_p12 = scmp.ne.s32.totalorder %s1001_s23, %s696_s15  ;;  %s772_s16 = smov [#allocation7]  }
  0x4f   : > { %268 = vadd.xlane.f32.xlu0 %v267_v11  ;;  %s700_s17 = sshll.u32 %s772_s16, 4  ;;  %s701_s17 = int_to_ptr.vmem [resolvable:$false] %s700_s17 }
  0x50   : > { %p698_p7 = pnand %p697_p12, %p1073_p1  ;;  %s702_s29 = scalar_lea.vmem %s701_s17, 2048 }
  0x51   : > { %p703_p9 = scmp.lt.s32.totalorder %s1001_s23, %s701_s17  ;;  %p704_p10 = scmp.lt.s32.totalorder %s702_s29, %s696_s15 }
  0x52   : > { %284 = vmax.xlane.f32.xlu1 %v283_v12  ;;  %p699_p8 = pneg %p698_p7 }
  0x53   : > { %281 = vmax.xlane.f32.xlu0 %v280_v13  ;;  %p705_p2 = por %p704_p10, %p703_p9 }
  0x55   : > { %p706_p0 = pnand %p705_p2, %p699_p8 }
  0x56   : > { %290 = vmax.xlane.f32.xlu1 %v289_v14 }
  0x57   : > { %287 = vmax.xlane.f32.xlu0 %v286_v15  ;;  %v352_v15 = vld [vmem:[%s1054_s3] sm:$0x3] }
  0x58   : > { %v379_v16 = vrot.slane %v352_v15, %v356_v42  ;;  %v406_v17 = vrot.slane %v352_v15, %v390_v38 }
  0xd3   : > { %v272_v18 = vpop.xlane.xlu1 %271 }
  0xd4   : > { %v266_v21 = vpop.xlane.xlu0 %265  ;;  %v278_v31 = vmul.f32 0.00390625, %v272_v18 }
  0xd5   : > { %v276_v26 = vmul.f32 0.00390625, %v266_v21 }
  0xd6   : > { %v313_v43 = vrot.slane %v278_v31, %v312_v30 }
  0xd7   : > { %v275_v23 = vpop.xlane.xlu1 %274  ;;  %v301_v34 = vrot.slane %v276_v26, %v300_v25 }
  0xd8   : > { %v269_v28 = vpop.xlane.xlu0 %268  ;;  %v279_v36 = vmul.f32 0.00390625, %v275_v23 }
  0xd9   : > { %v277_v29 = vmul.f32 0.00390625, %v269_v28 }
  0xda   : > { %v320_v46 = vrot.slane %v279_v36, %v319_v35 }
  0xdb   : > { %v306_v32 = vrot.slane %v277_v29, %v305_v24  ;;  %v285_v33 = vpop.xlane.xlu1 %284 }
  0xdc   : > { %v282_v37 = vpop.xlane.xlu0 %281  ;;  %v335_v40 = vrot.slane %v285_v33, %v305_v24 }
  0xdd   : > { %v308_v39 = vsel %vm307_vm0, %v306_v32, %v301_v34  ;;  %v331_v41 = vrot.slane %v282_v37, %v300_v25 }
  0xde   : > { %v315_v50 = vsel %vm314_vm1, %v313_v43, %v308_v39 }
  0xdf   : > { %v291_v44 = vpop.xlane.xlu1 %290  ;;  %v336_v51 = vsel %vm307_vm0, %v335_v40, %v331_v41  ;;  %v322_v56 = vsel %vm321_vm2, %v320_v46, %v315_v50 }
  0xe0   : > { %v288_v47 = vpop.xlane.xlu0 %287  ;;  %v345_v48 = vrot.slane %v291_v44, %v319_v35 }
  0xe1   : > { %v340_v49 = vrot.slane %v288_v47, %v312_v30 }
  0xe3   : > { %v341_v54 = vsel %vm314_vm1, %v340_v49, %v336_v51 }
  0xe4   : > { %v346_v55 = vsel %vm321_vm2, %v345_v48, %v341_v54 }
  0xe5   : > { %v349_v57 = vsel %vm348_vm3, %v322_v56, %v346_v55 }
  0xe6   : > { %v392_v58 = vmul.f32 %v391_v52, %v349_v57  ;;  %v358_v59 = vmul.f32 %v357_v53, %v349_v57 }
  0xe8   : > { %v393_v60 = vsel %vm359_vm4, %v392_v58, 0.0  ;;  %v360_v61 = vsel %vm359_vm4, %v358_v59, 0.0 }
  0xe9   : > { %394 = vadd.xlane.f32.xlu1 %v393_v60  ;;  %361 = vadd.xlane.f32.xlu0 %v360_v61 }
 0x172   : > { %v395_v7 = vpop.xlane.xlu1 %394  ;;  %v362_v10 = vpop.xlane.xlu0 %361 }
 0x173   : > { %v396_v11 = vadd.f32 %v562_v3, %v395_v7  ;;  %v369_v12 = vadd.f32 %v562_v3, %v362_v10 }
 0x175   : > { %v397_v13 = vmax.f32 %v396_v11, 0.0  ;;  %v370_v14 = vmax.f32 %v369_v12, 0.0 }
 0x177   : > { %400 = vperm.xlu1 %636, %v397_v13   ;;  %373 = vperm.xlu0 %635, %v370_v14  }
 0x17b   : > { %637 = vset.pattern.permute.xlu0 %v770_v62 }
 0x1f2   : > { %v401_v18 = vpop.permute.xlu1 %400  ;;  %v374_v20 = vpop.permute.xlu0 %373 }
 0x1f3   : > { %v380_v21 = vmul.f32 %v379_v16, %v374_v20  ;;  %v407_v22 = vmul.f32 %v406_v17, %v401_v18 }
 0x1f5   : > { %v387_v23 = vadd.f32 %v563_v19, %v380_v21 }
 0x1f7   : > { %v408_v24 = vadd.f32 %v407_v22, %v387_v23 }
 0x1f9   : > { %v410_v25 = vrot.slane %v408_v24, 1 }
 0x1fb   : > { %v412_v26 = vadd.f32 %v410_v25, %v408_v24 }
 0x1fd   : > { %v564_v27 = vmul.f32 -1.442695, %v412_v26 }
 0x1ff   : > { %638 = vpow2.f32 %v564_v27 }
 0x20c   : > { %v639_v28 = vpop.eup %638 }
 0x20d   : > { %v416_v29 = vadd.f32 1.0, %v639_v28 }
 0x20f   : > { %640 = vrcp.f32 %v416_v29 }
 0x21c   : > { %v641_v30 = vpop.eup %640 }
 0x21d   : > { %v422_v31 = vrot.slane %v641_v30, %v356_v42 }
 0x21f   : > { %424 = vbcast.lane.b32.xlu1 %v422_v31, 256 }
 0x223   : > { %428 = vbcast.lane.b32.xlu1 %v422_v31, 264 }
 0x227   : > { %432 = vbcast.lane.b32.xlu1 %v422_v31, 272 }
 0x22b   : > { %436 = vbcast.lane.b32.xlu1 %v422_v31, 280 }
 0x291   : > { %v425_v32 = vpop.permute.xlu1 %424 }
 0x292   : > { %v438_v33 = vmul.f32 %v425_v32, %v943_v2  ;;  %v439_v34 = vmul.f32 %v425_v32, %v947_v4 }
 0x294   : > { %446 = vst [vmem:[%s255_s11] sm:$0xff] %v438_v33  ;;  %447 = vst [vmem:[%s255_s11 + $0x8] sm:$0xff] %v439_v34 }
 0x295   : > { %v429_v35 = vpop.permute.xlu1 %428 }
 0x296   : > { %v440_v36 = vmul.f32 %v429_v35, %v955_v8  ;;  %v441_v37 = vmul.f32 %v429_v35, %v957_v9 }
 0x298   : > { %448 = vst [vmem:[%s255_s11 + $0x10] sm:$0xff] %v440_v36  ;;  %449 = vst [vmem:[%s255_s11 + $0x18] sm:$0xff] %v441_v37 }
 0x299   : > { %v433_v38 = vpop.permute.xlu1 %432 }
 0x29a   : > { %v442_v39 = vmul.f32 %v433_v38, %v939_v0  ;;  %v443_v2 = vmul.f32 %v433_v38, %v941_v1 }
 0x29c   : > { %450 = vst [vmem:[%s255_s11 + $0x20] sm:$0xff] %v442_v39  ;;  %451 = vst [vmem:[%s255_s11 + $0x28] sm:$0xff] %v443_v2 }
 0x29d   : > { %v437_v4 = vpop.permute.xlu1 %436 }
 0x29e   : > { %v444_v8 = vmul.f32 %v437_v4, %v949_v5  ;;  %v445_v0 = vmul.f32 %v437_v4, %v951_v6 }
 0x2a0   : > { %452 = vst [vmem:[%s255_s11 + $0x30] sm:$0xff] %v444_v8  ;;  %453 = vst [vmem:[%s255_s11 + $0x38] sm:$0xff] %v445_v0 }
 0x2a1   : > { %709 = shalt.err (!%p706_p0)
}
 0x2a2   : > { %s710_s7 = scalar_lea.hbm %s1006_s9, 1024  ;;  %s714_s8 = scalar_lea.hbm %s1056_s5, 2048 }
 0x2a3   : > { %p711_p4 = scmp.ne.s32.totalorder %s1006_s9, %s710_s7  ;;  %p715_p6 = scmp.lt.s32.totalorder %s1006_s9, %s1056_s5 }
 0x2a4   : > { %p716_p13 = scmp.lt.s32.totalorder %s714_s8, %s710_s7 }
 0x2a5   : > { %p712_p11 = pnand %p711_p4, %p1073_p1 }
 0x2a6   : > { %p717_p3 = por %p716_p13, %p715_p6 }
 0x2a7   : > { %p713_p5 = pneg %p712_p11 }
 0x2a9   : > { %p718_p12 = pnand %p717_p3, %p713_p5 }
 0x2ab   : > { %721 = shalt.err (!%p718_p12)
}
 0x2ac   : > { %s773_s26 = smov 256   ;;  %s774_s28 = smov 16  }
 0x2ad   : > { %578 = dma.vmem_to_hbm [thread:$0]  (%p1073_p1), %s1001_s23, 1024, %s1006_s9, %s455_s22, %s773_s26, %s773_s26, %s774_s28  }
 0x2ae PF: > { %s483_s14 = sand.u32 1, %s752_s18   ;;  %p1074_p7 = scmp.ne.s32.totalorder %s1064_s6, 0 }
 0x2af   : > { %p1075_p8 = scmp.ge.s32.totalorder %s764_s21, 2  ;;  %s484_s15 = scalar_lea.sflag [#allocation4], %s483_s14 }
 0x2b1   : > { %p589_p9 = pnand %p1075_p8, %p1074_p7 }
 0x2b3   : > { %p590_p10 = pneg %p589_p9 }
 0x2b5   : > { %747 = dma.done.wait (%p590_p10), %s484_s15, 1024  }
 0x2b6   : > { %749 = vsyncadd (%p590_p10), %s484_s15, 4294966272  ;;  %p19_p2 = scmp.ge.s32.totalorder %s830_s24, 4   ;;  %s1076_s18 = smov %s756_s19 }
 0x2b7   : > { %s1077_s19 = smov %s760_s20  ;;  %s1078_s20 = smov %s842_s27 }
 0x2b8   : > { %s1079_s21 = smov %s830_s24  ;;  %21 = sbr.rel (!%p19_p2) target bundleno = 6 (0x6), region = 89 }
 0x2bd   :  { %489 = vsyncpa [#allocation3], 1 }
 0x2be   :  { %491 = vsyncpa [#allocation3 + $0x1], 1 }
 0x2bf   :  { %492 = vsyncpa [#allocation6], 1 }
 0x2c0   :  { %493 = vsyncpa [#allocation4], 1 }
 0x2c1   :  { %495 = vsyncpa [#allocation4 + $0x1], 1 }

</bundles_post_ra>
